<compile_context>
chip_gen: v7x
topology: tpu7x:2x2x1
jax: 0.10.0
libtpu: 0.0.40
codegen_flags: <defaults>
</compile_context>

<pallas_src>
import numpy as np

import jax
import jax.numpy as jnp
from jax.experimental import pallas as pl
from jax.experimental.pallas import tpu as pltpu

NUM_HEADS = 2
LEAKY_SLOPE = 0.2
NEG_INF = -1e30

# (src_feature_key, dst_feature_key, adjacency_key, output_key) — mirrors the
# order of GATlayers[0](...) calls in GAT.forward for dataset='xmrec_mx',
# classify_as_edge=True.
ALL_ETYPES = (
    ("item",         "user",         "iu", "user"),
    ("user",         "item",         "ui", "item"),
    ("item_cate",    "cate",         "ic", "cate"),
    ("cate",         "item_cate",    "ci", "item_cate"),
    ("item_rate",    "rate",         "ir", "rate"),
    ("rate",         "item_rate",    "ri", "item_rate"),
    ("bT_idx",       "item_bT_idx",  "bi", "item_bT"),
    ("item_bT_idx",  "bT_idx",       "ib", "bT_idx"),
    ("cpr_idx",      "item_cpr_idx", "pi", "item_cpr"),
    ("item_cpr_idx", "cpr_idx",      "ip", "cpr_idx"),
)

OUTPUT_KEYS = ("user", "item", "item_cate", "item_rate", "item_bT",
               "item_cpr", "cate", "rate", "bT_idx", "cpr_idx")


def _round_up(x, m):
    return ((x + m - 1) // m) * m


# ----------------------------------------------------------------------------
# Stage 1: shared node-feature projection (one big, lane-dense matmul).
# ----------------------------------------------------------------------------
def _project_kernel(feat_ref, w_ref, out_ref):
    out_ref[...] = jnp.dot(feat_ref[...], w_ref[...],
                           preferred_element_type=jnp.float32)


def project_all(feat, w_aug, *, row_tile=512):
    """(N, D) @ (D, M) with M padded to a multiple of 128 (lane-dense store)."""
    n, d = feat.shape
    m = w_aug.shape[1]
    if n <= row_tile:
        row_tile = _round_up(n, 8)
        n_pad = row_tile
    else:
        n_pad = _round_up(n, row_tile)
    feat_p = jnp.pad(feat, ((0, n_pad - n), (0, 0)))
    out = pl.pallas_call(
        _project_kernel,
        out_shape=jax.ShapeDtypeStruct((n_pad, m), jnp.float32),
        grid_spec=pltpu.PrefetchScalarGridSpec(
            num_scalar_prefetch=0,
            grid=(n_pad // row_tile,),
            in_specs=[
                pl.BlockSpec((row_tile, d), lambda i: (i, 0)),
                pl.BlockSpec((d, m), lambda i: (0, 0)),
            ],
            out_specs=pl.BlockSpec((row_tile, m), lambda i: (i, 0)),
        ),
        compiler_params=pltpu.CompilerParams(dimension_semantics=("parallel",)),
    )(feat_p, w_aug)
    return out[:n]


# ----------------------------------------------------------------------------
# Stage 2: fused edge-softmax + aggregation over ALL edge types.
#   grid = (flat dst tile over all edge types, source tile)
#   online softmax over the (reduction) source axis; scalar-prefetched
#   per-dst-tile source block offsets / counts avoid per-edge-type duplication.
# ----------------------------------------------------------------------------
def _gat_attn_kernel(src_blk_ref, ns_blk_ref,
                     edst_ref, esrc_ref, z_ref, adj_ref,
                     out_ref, m_sc, l_sc, acc_sc):
    g = pl.program_id(0)                       # flat dst tile
    s = pl.program_id(1)                       # source tile (reduction axis)
    num_heads = edst_ref.shape[-1]
    do = acc_sc.shape[-1] // num_heads

    @pl.when(s == 0)
    def _init():
        m_sc[...] = jnp.full_like(m_sc, NEG_INF)
        l_sc[...] = jnp.zeros_like(l_sc)
        acc_sc[...] = jnp.zeros_like(acc_sc)

    # Skip source tiles that are pure padding for this edge type.
    @pl.when(s < ns_blk_ref[g])
    def _accumulate():
        # Per-tile int8 -> f32 conversion (bounded by the tile); keeps the mask on
        # the safe f32 compare/select lowering path.
        adj_f = adj_ref[...].astype(jnp.float32)          # (tile_nd, tile_ns)
        mask = adj_f > 0.0
        edst = edst_ref[...]                              # (tile_nd, H)  f32
        esrc = esrc_ref[...]                              # (H, tile_ns)  f32
        z = z_ref[...]                                    # (tile_ns, H*Do) bf16

        for h in range(num_heads):                        # unrolled (H == 2)
            sc = edst[:, h:h + 1] + esrc[h:h + 1, :]                      # (tile_nd, tile_ns)
            sc = jnp.where(sc > 0, sc, LEAKY_SLOPE * sc)                  # LeakyReLU
            sc = jnp.where(mask, sc, NEG_INF)
            m_old = m_sc[:, h:h + 1]
            m_new = jnp.maximum(m_old, jnp.max(sc, axis=-1, keepdims=True))
            alpha = jnp.exp(m_old - m_new)
            p = jnp.where(mask, jnp.exp(sc - m_new), 0.0)
            l_sc[:, h:h + 1] = (alpha * l_sc[:, h:h + 1]
                                + jnp.sum(p, axis=-1, keepdims=True))
            acc_sc[:, h * do:(h + 1) * do] = (
                alpha * acc_sc[:, h * do:(h + 1) * do]
                + jnp.dot(p.astype(z.dtype), z[:, h * do:(h + 1) * do],
                          preferred_element_type=jnp.float32))
            m_sc[:, h:h + 1] = m_new

    @pl.when(s == pl.num_programs(1) - 1)
    def _finalize():
        inv = pl.reciprocal(jnp.maximum(l_sc[...], 1e-9), approx=True)    # (tile_nd, H)
        for h in range(num_heads):                        # write each head directly
            out_ref[:, h * do:(h + 1) * do] = (
                acc_sc[:, h * do:(h + 1) * do] * inv[:, h:h + 1]
            ).astype(out_ref.dtype)


def gat_attention(src_blk, ns_blk, edst_cat, esrc_cat, z_cat, adj_cat,
                  *, tile_nd, tile_ns, num_src_tiles):
    """All edge types in ONE pallas_call; no padded duplication of z / e_src."""
    n_dst_rows, nh = edst_cat.shape
    hdo = z_cat.shape[-1]
    assert n_dst_rows % tile_nd == 0
    num_dst_tiles = n_dst_rows // tile_nd

    def clamp_src(g, s, so, nb):
        # Clamp to the last valid source block of this edge type's source node
        # type: avoids OOB reads and avoids re-DMA of z/e_src on skipped tiles.
        return so[g] + jnp.minimum(s, nb[g] - 1)

    return pl.pallas_call(
        _gat_attn_kernel,
        out_shape=jax.ShapeDtypeStruct((n_dst_rows, hdo), jnp.float32),
        grid_spec=pltpu.PrefetchScalarGridSpec(
            num_scalar_prefetch=2,
            grid=(num_dst_tiles, num_src_tiles),
            in_specs=[
                pl.BlockSpec((tile_nd, nh), lambda g, s, so, nb: (g, 0)),
                pl.BlockSpec((nh, tile_ns),
                             lambda g, s, so, nb: (0, clamp_src(g, s, so, nb))),
                pl.BlockSpec((tile_ns, hdo),
                             lambda g, s, so, nb: (clamp_src(g, s, so, nb), 0)),
                pl.BlockSpec((tile_nd, tile_ns), lambda g, s, so, nb: (g, s)),
            ],
            out_specs=pl.BlockSpec((tile_nd, hdo), lambda g, s, so, nb: (g, 0)),
            scratch_shapes=[
                pltpu.VMEM((tile_nd, nh), jnp.float32),    # running max
                pltpu.VMEM((tile_nd, nh), jnp.float32),    # running denom
                pltpu.VMEM((tile_nd, hdo), jnp.float32),   # running weighted sum
            ],
        ),
        compiler_params=pltpu.CompilerParams(
            dimension_semantics=("parallel", "arbitrary")),
    )(src_blk, ns_blk, edst_cat, esrc_cat, z_cat, adj_cat)


# ----------------------------------------------------------------------------
# Module glue (params, node features, forward)
# ----------------------------------------------------------------------------
def prompt_cat(node_embedding, prompt_embedding, n_node):
    """torch.cat((prompt.expand(n_node, -1), node), dim=1)"""
    return jnp.concatenate(
        [jnp.broadcast_to(prompt_embedding, (n_node, prompt_embedding.shape[-1])),
         node_embedding], axis=1)


def init_params(key, *, hid_dim, prompt, n_users, n_items, n_cates, n_rates,
                n_bt, n_cpr):
    d = hid_dim * (2 ** prompt)
    ks = jax.random.split(key, 16)
    p = {}
    p["user_embedding"] = 0.1 * jax.random.normal(ks[0], (n_users, d), jnp.float32)
    p["item_embedding"] = 0.1 * jax.random.normal(ks[1], (n_items, hid_dim), jnp.float32)
    p["cate_embedding"] = jax.random.normal(ks[2], (n_cates, d), jnp.float32)
    p["rate_embedding"] = jax.random.normal(ks[3], (n_rates, d), jnp.float32)
    p["bT_embedding"] = jax.random.normal(ks[4], (n_bt, d), jnp.float32)
    p["cpr_embedding"] = jax.random.normal(ks[5], (n_cpr, d), jnp.float32)
    p["ui_task"] = jax.random.normal(ks[6], (1, hid_dim), jnp.float32)
    p["ic_task"] = jax.random.normal(ks[7], (1, hid_dim), jnp.float32)
    p["ir_task"] = jax.random.normal(ks[8], (1, hid_dim), jnp.float32)
    p["ib_task"] = jax.random.normal(ks[9], (1, hid_dim), jnp.float32)
    p["ip_task"] = jax.random.normal(ks[10], (1, hid_dim), jnp.float32)
    # MultiHeadGATLayer weights (shared across edge types, GATlayers[0]).
    scale = 1.0 / jnp.sqrt(jnp.float32(d))
    p["W"] = scale * jax.random.normal(ks[11], (NUM_HEADS, d, d), jnp.float32)
    p["a_src"] = scale * jax.random.normal(ks[12], (NUM_HEADS, d, 1), jnp.float32)
    p["a_dst"] = scale * jax.random.normal(ks[13], (NUM_HEADS, d, 1), jnp.float32)
    return p


def build_node_features(p, *, prompt, n_items):
    if prompt:
        return {
            "user": p["user_embedding"],
            "item": prompt_cat(p["item_embedding"], p["ui_task"], n_items),
            "item_cate": prompt_cat(p["item_embedding"], p["ic_task"], n_items),
            "item_rate": prompt_cat(p["item_embedding"], p["ir_task"], n_items),
            "cate": p["cate_embedding"],
            "rate": p["rate_embedding"],
            "bT_idx": p["bT_embedding"],
            "item_bT_idx": prompt_cat(p["item_embedding"], p["ib_task"], n_items),
            "cpr_idx": p["cpr_embedding"],
            "item_cpr_idx": prompt_cat(p["item_embedding"], p["ip_task"], n_items),
        }
    return {
        "user": p["user_embedding"],
        "item": p["item_embedding"],
        "item_cate": p["item_embedding"],
        "item_rate": p["item_embedding"],
        "cate": p["cate_embedding"],
        "rate": p["rate_embedding"],
        "bT_idx": p["bT_embedding"],
        "item_bT_idx": p["item_embedding"],
        "cpr_idx": p["cpr_embedding"],
        "item_cpr_idx": p["item_embedding"],
    }


def gat_forward(params, adjs, *, prompt, n_items, pre_train=True):
    """Reproduces GAT.forward for dataset='xmrec_mx', classify_as_edge=True."""
    h = build_node_features(params, prompt=prompt, n_items=n_items)
    W, a_s, a_d = params["W"], params["a_src"], params["a_dst"]
    num_heads, d, do = W.shape
    hdo = num_heads * do
    hi = jax.lax.Precision.HIGHEST

    etypes = ALL_ETYPES if pre_train else ALL_ETYPES[:2]

    # Node types appearing as src or dst (each projected exactly once).
    node_types = []
    for skey, dkey, _, _ in etypes:
        for t in (skey, dkey):
            if t not in node_types:
                node_types.append(t)

    # Tile sizes: int8 adjacency likes 32-row multiples; src tile lane-dense.
    max_ns_raw = max(h[skey].shape[0] for skey, _, _, _ in etypes)
    max_nd_raw = max(h[dkey].shape[0] for _, dkey, _, _ in etypes)
    tile_ns = min(512, _round_up(max_ns_raw, 128))
    tile_nd = min(256, _round_up(max_nd_raw, 32))

    # --- Stage 0: augmented projection weight (attention vectors folded in) ---
    w_cols = [W[hh] for hh in range(num_heads)]
    e_cols = []
    for hh in range(num_heads):
        e_cols.append(jnp.dot(W[hh], a_s[hh], precision=hi))   # (d, 1)
        e_cols.append(jnp.dot(W[hh], a_d[hh], precision=hi))   # (d, 1)
    w_aug = jnp.concatenate(w_cols + e_cols, axis=-1)          # (d, H*Do + 2H)
    n_aug_pad = _round_up(hdo + 2 * num_heads, 128)            # lane-dense output
    w_aug = jnp.pad(w_aug, ((0, 0), (0, n_aug_pad - w_aug.shape[1])))

    # --- Stage 1: project every node type exactly once, padded per type to a
    #     multiple of tile_ns so source-block offsets are block-aligned. ---
    feats = []
    row_off, blk_off, n_blk = {}, {}, {}
    off = 0
    for t in node_types:
        ft = h[t].astype(jnp.float32)
        n = ft.shape[0]
        n_pad = _round_up(n, tile_ns)
        feats.append(jnp.pad(ft, ((0, n_pad - n), (0, 0))))
        row_off[t] = off
        blk_off[t] = off // tile_ns
        n_blk[t] = n_pad // tile_ns
        off += n_pad
    z_all = project_all(jnp.concatenate(feats, axis=0), w_aug)   # (Ntot_pad, n_aug_pad)

    # Aggregation operands in bf16 (halves HBM/VMEM; f32 accumulation in-kernel);
    # logit halves stay f32 so the softmax weights are f32-accurate.
    z_cat = z_all[:, :hdo].astype(jnp.bfloat16)                              # (Ntot, H*Do)
    esrc_cat = jnp.transpose(z_all[:, hdo:hdo + 2 * num_heads:2])            # (H, Ntot)
    edst_nodewise = z_all[:, hdo + 1:hdo + 2 * num_heads:2]                  # (Ntot, H)

    num_src_tiles = max(n_blk[skey] for skey, _, _, _ in etypes)
    max_ns_pad = num_src_tiles * tile_ns

    # --- Stage 2 packing: concatenate per-edge-type data along the dst axis only
    #     (adjacency int8, dst logits); source-side data is NOT duplicated. ---
    edst_parts, adj_parts = [], []
    src_blk_list, ns_blk_list, dst_row_off = [], [], []
    dst_rows = 0
    for skey, dkey, akey, _ in etypes:
        ns, nd = h[skey].shape[0], h[dkey].shape[0]
        nd_pad = _round_up(nd, tile_nd)
        g_e = nd_pad // tile_nd
        ed = edst_nodewise[row_off[dkey]:row_off[dkey] + nd]
        edst_parts.append(jnp.pad(ed, ((0, nd_pad - nd), (0, 0))))
        adj_parts.append(jnp.pad(adjs[akey].astype(jnp.int8),
                                 ((0, nd_pad - nd), (0, max_ns_pad - ns))))
        src_blk_list += [blk_off[skey]] * g_e
        ns_blk_list += [n_blk[skey]] * g_e
        dst_row_off.append(dst_rows)
        dst_rows += nd_pad

    edst_cat = jnp.concatenate(edst_parts, axis=0)                # (dst_rows, H)
    adj_cat = jnp.concatenate(adj_parts, axis=0)                  # (dst_rows, max_ns_pad) int8
    src_blk = jnp.asarray(src_blk_list, dtype=jnp.int32)
    ns_blk = jnp.asarray(ns_blk_list, dtype=jnp.int32)

    out_cat = gat_attention(src_blk, ns_blk, edst_cat, esrc_cat, z_cat, adj_cat,
                            tile_nd=tile_nd, tile_ns=tile_ns,
                            num_src_tiles=num_src_tiles)

    # --- head merge (mean) + unpad: cheap XLA reshapes outside the kernel ---
    results = {k: [] for k in OUTPUT_KEYS}
    for i, (skey, dkey, akey, okey) in enumerate(etypes):
        nd = h[dkey].shape[0]
        r0 = dst_row_off[i]
        out_e = out_cat[r0:r0 + nd, :].reshape(nd, num_heads, do)
        results[okey] = out_e.mean(axis=1)
    return results


# ----------------------------------------------------------------------------
# Pure-JAX reference (for correctness checking only)
# ----------------------------------------------------------------------------
def _gat_layer_ref(src_feat, dst_feat, adj, W, a_s, a_d):
    hi = jax.lax.Precision.HIGHEST
    outs = []
    for hh in range(W.shape[0]):
        z_s = jnp.dot(src_feat, W[hh], precision=hi)
        z_d = jnp.dot(dst_feat, W[hh], precision=hi)
        e_s = jnp.dot(z_s, a_s[hh], precision=hi)    # (Ns, 1)
        e_d = jnp.dot(z_d, a_d[hh], precision=hi)    # (Nd, 1)
        sc = e_d + e_s.T
        sc = jnp.where(sc > 0, sc, LEAKY_SLOPE * sc)
        sc = jnp.where(adj > 0, sc, NEG_INF)
        p = jnp.exp(sc - jnp.max(sc, axis=-1, keepdims=True)) * adj
        denom = jnp.maximum(jnp.sum(p, axis=-1, keepdims=True), 1e-9)
        outs.append(jnp.dot(p, z_s, precision=hi) / denom)
    return sum(outs) / W.shape[0]


if __name__ == "__main__":
    # Small synthetic heterograph:  args.prompt=1, args.classify_as_edge=True,
    # args.dataset='xmrec_mx', hid_dim(in_dim)=16 -> feature dim D = 32.
    hid_dim, prompt = 16, 1
    n_users, n_items, n_cates, n_rates, n_bt, n_cpr = 8, 16, 4, 5, 6, 3

    key = jax.random.PRNGKey(0)
    k_param, k_iu, k_ic, k_ir, k_ib, k_ip = jax.random.split(key, 6)

    params = init_params(
        k_param, hid_dim=hid_dim, prompt=prompt, n_users=n_users, n_items=n_items,
        n_cates=n_cates, n_rates=n_rates, n_bt=n_bt, n_cpr=n_cpr)

    def bipartite(k, n_dst, n_src):
        # adjacency shipped as int8 0/1 mask (4x less HBM traffic than float32)
        return jax.random.bernoulli(k, 0.5, (n_dst, n_src)).astype(jnp.int8)

    iu = bipartite(k_iu, n_users, n_items)
    ic = bipartite(k_ic, n_cates, n_items)
    ir = bipartite(k_ir, n_rates, n_items)
    ib = bipartite(k_ib, n_bt, n_items)
    ip = bipartite(k_ip, n_cpr, n_items)
    adjs = {
        "iu": iu, "ui": iu.T,
        "ic": ic, "ci": ic.T,
        "ir": ir, "ri": ir.T,
        "ib": ib, "bi": ib.T,
        "ip": ip, "pi": ip.T,
    }

    out = gat_forward(params, adjs, prompt=prompt, n_items=n_items, pre_train=True)
    out = jax.block_until_ready(out)

    d = hid_dim * (2 ** prompt)
    assert out["user"].shape == (n_users, d)
    assert out["item"].shape == (n_items, d)
    assert out["item_cate"].shape == (n_items, d)
    assert out["cate"].shape == (n_cates, d)
    assert out["bT_idx"].shape == (n_bt, d)
    assert all(bool(jnp.all(jnp.isfinite(v))) for v in out.values())

    # Cross-check against a pure-JAX reference of the same GAT math.
    h_feat = build_node_features(params, prompt=prompt, n_items=n_items)
    for skey, dkey, akey, okey in ALL_ETYPES:
        ref = _gat_layer_ref(h_feat[skey], h_feat[dkey],
                             adjs[akey].astype(jnp.float32),
                             params["W"], params["a_src"], params["a_dst"])
        np.testing.assert_allclose(np.asarray(out[okey]), np.asarray(ref),
                                   rtol=2e-2, atol=2e-2)

    print("KERNEL_OK")
</pallas_src>

<mosaic_0001>
module attributes {stable_mosaic.version = 11 : i64} {
  func.func @_project_kernel(%arg0: i32, %arg1: memref<512x32xf32, #tpu.memory_space<vmem>>, %arg2: memref<32x128xf32, #tpu.memory_space<vmem>>, %arg3: memref<512x128xf32, #tpu.memory_space<vmem>>) attributes {dimension_semantics = [#tpu.dimension_semantics<parallel>], iteration_bounds = array<i64: 3>, scalar_prefetch = 0 : i64, scratch_operands = 0 : i64, tpu.core_type = #tpu.core_type<tc>, window_params = [{transform_indices = @transform_0, window_bounds = array<i64: 512, 32>}, {pipeline_mode = #tpu.pipeline_mode<synchronous>, transform_indices = @transform_1, window_bounds = array<i64: 32, 128>}, {transform_indices = @transform_2, window_bounds = array<i64: 512, 128>}]} {
    %c0 = arith.constant 0 : index
    %c0_0 = arith.constant 0 : index
    %0 = vector.load %arg1[%c0, %c0_0] : memref<512x32xf32, #tpu.memory_space<vmem>>, vector<512x32xf32>
    %c0_1 = arith.constant 0 : index
    %c0_2 = arith.constant 0 : index
    %1 = vector.load %arg2[%c0_1, %c0_2] : memref<32x128xf32, #tpu.memory_space<vmem>>, vector<32x128xf32>
    %cst = arith.constant dense<0.000000e+00> : vector<512x128xf32>
    %2 = tpu.matmul %0, %1, %cst {dimension_numbers = #tpu.dot_dimension_numbers<[1], [0], [0], [1], [0, 0, 1, 1], [], []>} : vector<512x32xf32>, vector<32x128xf32>, vector<512x128xf32> -> vector<512x128xf32>
    %c0_3 = arith.constant 0 : index
    %c0_4 = arith.constant 0 : index
    %3 = vector.load %arg3[%c0_3, %c0_4] : memref<512x128xf32, #tpu.memory_space<vmem>>, vector<512x128xf32>
    tpu.vector_store %arg3[%c0_3, %c0_4], %2 {strides = array<i32>} : memref<512x128xf32, #tpu.memory_space<vmem>>, vector<512x128xf32>,
    return
  }
  func.func @transform_0(%arg0: i32) -> (i32, i32) {
    %c0_i32 = arith.constant 0 : i32
    %c0_i32_0 = arith.constant 0 : i32
    return %arg0, %c0_i32 : i32, i32
  }
  func.func @transform_1(%arg0: i32) -> (i32, i32) {
    %c0_i32 = arith.constant 0 : i32
    %c0_i32_0 = arith.constant 0 : i32
    %c0_i32_1 = arith.constant 0 : i32
    return %c0_i32, %c0_i32_0 : i32, i32
  }
  func.func @transform_2(%arg0: i32) -> (i32, i32) {
    %c0_i32 = arith.constant 0 : i32
    %c0_i32_0 = arith.constant 0 : i32
    return %arg0, %c0_i32 : i32, i32
  }
}

</mosaic_0001>

<bundles_post_ra>
// kernel: tpu_custom_call.1
= control target key start
LH: loop header
LB: loop body
LE: loop exit
PB: predicated region body
PF: predicated region fallthrough
CT: control target
= control target key end

     0   :  { %7 = vsyncpa [#allocation3], 0  ;;  %s1630_s0 = inlined_call_operand.vmem [shape: f32[1536,32], index: 0, kind: input, shape index: {}]   ;;  %s1631_s1 = inlined_call_operand.vmem [shape: f32[32,128], index: 1, kind: input, shape index: {}]   ;;  %s1632_s2 = inlined_call_operand.hbm [shape: f32[1536,128], index: 2, kind: output, shape index: {}]  }
   0x1   :  { %9 = vsyncpa [#allocation3 + $0x1], 0  ;;  %s1315_s9 = smov 0   ;;  %s1317_s10 = smov 0  }
   0x2   :  { %s1319_s11 = smov 0   ;;  %s1321_s12 = smov 0  }
   0x3 LB: > { %s1336_s13 = sadd.s32 4294967295, %s1295_s12   ;;  %s931_s14 = sadd.s32 4294967294, %s1295_s12   ;;  %s1295_s12 = sphi %s1321_s12, %s1638_s12   ;;  %s1291_s11 = sphi %s1319_s11, %s1637_s11   ;;  %s1287_s10 = sphi %s1317_s10, %s1636_s10   ;;  %s1283_s9 = sphi %s1315_s9, %s1635_s9  }
   0x4   : > { %s1340_s15 = sadd.s32 1, %s1295_s12   ;;  %s69_s16 = sadd.s32 1, %s1291_s11 }
   0x5   : > { %s66_s17 = ssub.s32 %s1295_s12, %s1340_s15  ;;  %p79_p0 = scmp.ne.s32.totalorder %s1291_s11, %s1287_s10 }
   0x6   : > { %p67_p1 = scmp.eq.s32.totalorder %s66_s17, 0  ;;  %p80_p2 = scmp.eq.s32.totalorder %s1336_s13, 2 }
   0x7   : > { %p85_p3 = scmp.ne.s32.totalorder %s1287_s10, %s1283_s9  ;;  %p86_p4 = scmp.eq.s32.totalorder %s931_s14, 2 }
   0x8   : > { %s1351_s18 = scalar_select %p67_p1, %s1291_s11, %s69_s16  }
   0x9   : > { %p1353_p5 = por %p80_p2, %p79_p0  ;;  %p1357_p6 = por %p86_p4, %p85_p3 }
   0xa   : > { %p934_p7 = scmp.ge.s32.totalorder %s1295_s12, 1  ;;  %p116_p8 = scmp.lt.s32.totalorder %s1295_s12, 4 }
   0xc   : > { %p117_p9 = pnand %p934_p7, %p116_p8 }
   0xd   : > { %v209_v0 = vld [vmem:[%s1631_s1] sm:$0xff] (!%p117_p9)  ;;  %v210_v1 = vld [vmem:[%s1631_s1 + $0x8] sm:$0xff] (!%p117_p9)  ;;  %v211_v2 = vld [vmem:[%s1631_s1 + $0x10] sm:$0xff] (!%p117_p9)  ;;  %s936_s27 = sshll.u32 (!%p117_p9), %s1336_s13, 6  ;;  %vm213_vm0 = vcmask (!%p117_p9), 261120   ;;  %s135_s6 = sand.u32 (!%p117_p9), 1, %s1287_s10  }
   0xe   : > { %120 = sbr.rel (%p117_p9) target bundleno = 315 (0x13b), region = 28  ;;  %v1180_v3 = vpack.c.bf16 (!%p117_p9), %v210_v1, %v209_v0  ;;  %v212_v4 = vld [vmem:[%s1631_s1 + $0x18] sm:$0xff] (!%p117_p9)  ;;  %p139_p10 = scmp.lt.s32.totalorder (!%p117_p9), %s936_s27, 191 }
   0xf   : > { %v1184_v5 = vpack.c.bf16 (!%p117_p9), %v212_v4, %v211_v2  ;;  %s935_s7 = sshll.u32 (!%p117_p9), %s135_s6, 9  ;;  %s1007_s14 = sshll.u32 (!%p117_p9), %s1336_s13, 13 }
  0x10   : > { %1181 = vmatprep.subr.bf16.mxu0 (!%p117_p9), %v1180_v3  ;;  %1188 = vmatprep.subr.bf16.mxu1 (!%p117_p9), %v1180_v3  ;;  %s1512_s8 = scalar_lea.vmem (!%p117_p9), [#allocation2], %s935_s7  ;;  %s1579_s22 = scalar_lea.hbm (!%p117_p9), %s1632_s2, %s1007_s14 }
  0x11   : > { %1183 = vmatpush3.bf16.msra.mxu0 (!%p117_p9), %v1180_v3  ;;  %1190 = vmatpush3.bf16.msra.mxu1 (!%p117_p9), %v1180_v3  ;;  %s869_s16 = sshll.u32 (!%p117_p9), %s1512_s8, 4  ;;  %s1589_s13 = scalar_lea.sflag (!%p117_p9), [#allocation3], %s135_s6  ;;  %s1581_s16 = int_to_ptr.vmem [resolvable:$true] %s869_s16 }
  0x12   : > { %1185 = vmatprep.subr.bf16.mxu0 (!%p117_p9), %v1184_v5  ;;  %1189 = vmatprep.subr.bf16.mxu1 (!%p117_p9), %v1184_v5  ;;  %s1233_s23 = scalar_lea.vmem (!%p117_p9), %s1581_s16, 8192  ;;  %s1297_s24 = smov (!%p117_p9), [#allocation2]  }
  0x13   : > { %p1234_p11 = scmp.ne.s32.totalorder (!%p117_p9), %s1581_s16, %s1233_s23  ;;  %s1237_s25 = sshll.u32 (!%p117_p9), %s1297_s24, 4  ;;  %s1238_s25 = int_to_ptr.vmem [resolvable:$false] %s1237_s25 }
  0x14   : > { %s1239_s26 = scalar_lea.vmem (!%p117_p9), %s1238_s25, 16384  ;;  %p1240_p0 = scmp.lt.s32.totalorder (!%p117_p9), %s1581_s16, %s1238_s25 }
  0x15   : > { %s1640_s27 = smov (!%p139_p10, %s936_s27), 191  ;;  %1187 = vmatpush3.bf16.msra.mxu0 %v1184_v5  ;;  %1191 = vmatpush3.bf16.msra.mxu1 %v1184_v5  ;;  %p1235_p12 = pnand %p1234_p11, %p1353_p5 }
  0x16   : > { %s937_s30 = sshll.u32 %s1640_s27, 3  ;;  %p1241_p1 = scmp.lt.s32.totalorder %s1239_s26, %s1233_s23 }
  0x17   : > { %s1379_s5 = scalar_lea.vmem %s1630_s0, %s937_s30  ;;  %p1236_p13 = pneg %p1235_p12 }
  0x18   : > { %v145_v6 = vld [vmem:[%s1379_s5] sm:$0xff]  ;;  %v146_v8 = vld [vmem:[%s1379_s5 + $0x8] sm:$0xff]  ;;  %v147_v10 = vld [vmem:[%s1379_s5 + $0x10] sm:$0xff]  ;;  %p1242_p2 = por %p1241_p1, %p1240_p0 }
  0x19   : > { %v177_v7 = vld [vmem:[%s1379_s5 + $0x100] sm:$0xff]  ;;  %v178_v9 = vld [vmem:[%s1379_s5 + $0x108] sm:$0xff]  ;;  %1084 = vmatprep.mubr.msk.f32.mxu0 %vm213_vm0, %v145_v6  ;;  %v179_v11 = vld [vmem:[%s1379_s5 + $0x110] sm:$0xff] }
  0x1a   : > { %1132 = vmatprep.mubr.msk.f32.mxu1 %vm213_vm0, %v177_v7  ;;  %1085 = vmatmul.mubr.msk.f32.vlgmr.msra.gmra.mrb[0].mxu0 %vm213_vm0, %v146_v8  ;;  %v148_v12 = vld [vmem:[%s1379_s5 + $0x18] sm:$0xff]  ;;  %v149_v14 = vld [vmem:[%s1379_s5 + $0x20] sm:$0xff]  ;;  %v150_v16 = vld [vmem:[%s1379_s5 + $0x28] sm:$0xff]  ;;  %p1243_p3 = pnand %p1242_p2, %p1236_p13 }
  0x1b   : > { %1133 = vmatmul.mubr.msk.f32.vlgmr.msra.gmra.mrb[0].mxu1 %vm213_vm0, %v178_v9  ;;  %1087 = vmatprep.mubr.msk.f32.mxu0 %vm213_vm0, %v147_v10  ;;  %v180_v13 = vld [vmem:[%s1379_s5 + $0x118] sm:$0xff]  ;;  %v181_v15 = vld [vmem:[%s1379_s5 + $0x120] sm:$0xff]  ;;  %v182_v17 = vld [vmem:[%s1379_s5 + $0x128] sm:$0xff] }
  0x1c   : > { %1135 = vmatprep.mubr.msk.f32.mxu1 %vm213_vm0, %v179_v11  ;;  %v151_v18 = vld [vmem:[%s1379_s5 + $0x30] sm:$0xff]  ;;  %v152_v20 = vld [vmem:[%s1379_s5 + $0x38] sm:$0xff]  ;;  %v153_v22 = vld [vmem:[%s1379_s5 + $0x40] sm:$0xff] }
  0x1d   : > { %v183_v19 = vld [vmem:[%s1379_s5 + $0x130] sm:$0xff]  ;;  %v184_v21 = vld [vmem:[%s1379_s5 + $0x138] sm:$0xff]  ;;  %v185_v23 = vld [vmem:[%s1379_s5 + $0x140] sm:$0xff] }
  0x1e   : > { %1088 = vmatmul.mubr.msk.f32.gmra.mrb[2].mxu0 %vm213_vm0, %v148_v12  ;;  %v154_v24 = vld [vmem:[%s1379_s5 + $0x48] sm:$0xff]  ;;  %v155_v26 = vld [vmem:[%s1379_s5 + $0x50] sm:$0xff]  ;;  %v156_v28 = vld [vmem:[%s1379_s5 + $0x58] sm:$0xff] }
  0x1f   : > { %1136 = vmatmul.mubr.msk.f32.gmra.mrb[2].mxu1 %vm213_vm0, %v180_v13  ;;  %1090 = vmatprep.mubr.msk.f32.mxu0 %vm213_vm0, %v149_v14  ;;  %v186_v25 = vld [vmem:[%s1379_s5 + $0x148] sm:$0xff]  ;;  %v187_v27 = vld [vmem:[%s1379_s5 + $0x150] sm:$0xff]  ;;  %v188_v29 = vld [vmem:[%s1379_s5 + $0x158] sm:$0xff] }
  0x20   : > { %1138 = vmatprep.mubr.msk.f32.mxu1 %vm213_vm0, %v181_v15  ;;  %v157_v30 = vld [vmem:[%s1379_s5 + $0x60] sm:$0xff]  ;;  %v158_v32 = vld [vmem:[%s1379_s5 + $0x68] sm:$0xff]  ;;  %v159_v34 = vld [vmem:[%s1379_s5 + $0x70] sm:$0xff] }
  0x21   : > { %v189_v31 = vld [vmem:[%s1379_s5 + $0x160] sm:$0xff]  ;;  %v190_v33 = vld [vmem:[%s1379_s5 + $0x168] sm:$0xff]  ;;  %v191_v35 = vld [vmem:[%s1379_s5 + $0x170] sm:$0xff] }
  0x22   : > { %1091 = vmatmul.mubr.msk.f32.gmra.mrb[4].mxu0 %vm213_vm0, %v150_v16  ;;  %v160_v36 = vld [vmem:[%s1379_s5 + $0x78] sm:$0xff]  ;;  %v161_v38 = vld [vmem:[%s1379_s5 + $0x80] sm:$0xff]  ;;  %v162_v40 = vld [vmem:[%s1379_s5 + $0x88] sm:$0xff] }
  0x23   : > { %1139 = vmatmul.mubr.msk.f32.gmra.mrb[4].mxu1 %vm213_vm0, %v182_v17  ;;  %1093 = vmatprep.mubr.msk.f32.mxu0 %vm213_vm0, %v151_v18  ;;  %v192_v37 = vld [vmem:[%s1379_s5 + $0x178] sm:$0xff]  ;;  %v193_v39 = vld [vmem:[%s1379_s5 + $0x180] sm:$0xff]  ;;  %v194_v41 = vld [vmem:[%s1379_s5 + $0x188] sm:$0xff] }
  0x24   : > { %1141 = vmatprep.mubr.msk.f32.mxu1 %vm213_vm0, %v183_v19  ;;  %v163_v42 = vld [vmem:[%s1379_s5 + $0x90] sm:$0xff]  ;;  %v164_v44 = vld [vmem:[%s1379_s5 + $0x98] sm:$0xff]  ;;  %v165_v46 = vld [vmem:[%s1379_s5 + $0xa0] sm:$0xff] }
  0x25   : > { %v195_v43 = vld [vmem:[%s1379_s5 + $0x190] sm:$0xff]  ;;  %v196_v45 = vld [vmem:[%s1379_s5 + $0x198] sm:$0xff]  ;;  %v197_v47 = vld [vmem:[%s1379_s5 + $0x1a0] sm:$0xff] }
  0x26   : > { %1094 = vmatmul.mubr.msk.f32.gmra.mrb[6].mxu0 %vm213_vm0, %v152_v20  ;;  %v166_v48 = vld [vmem:[%s1379_s5 + $0xa8] sm:$0xff]  ;;  %v167_v50 = vld [vmem:[%s1379_s5 + $0xb0] sm:$0xff]  ;;  %v168_v52 = vld [vmem:[%s1379_s5 + $0xb8] sm:$0xff] }
  0x27   : > { %1142 = vmatmul.mubr.msk.f32.gmra.mrb[6].mxu1 %vm213_vm0, %v184_v21  ;;  %1096 = vmatprep.mubr.msk.f32.mxu0 %vm213_vm0, %v153_v22  ;;  %v198_v49 = vld [vmem:[%s1379_s5 + $0x1a8] sm:$0xff]  ;;  %v199_v51 = vld [vmem:[%s1379_s5 + $0x1b0] sm:$0xff]  ;;  %v200_v53 = vld [vmem:[%s1379_s5 + $0x1b8] sm:$0xff] }
  0x28   : > { %1144 = vmatprep.mubr.msk.f32.mxu1 %vm213_vm0, %v185_v23  ;;  %v169_v54 = vld [vmem:[%s1379_s5 + $0xc0] sm:$0xff]  ;;  %v170_v56 = vld [vmem:[%s1379_s5 + $0xc8] sm:$0xff]  ;;  %v171_v58 = vld [vmem:[%s1379_s5 + $0xd0] sm:$0xff] }
  0x29   : > { %v201_v55 = vld [vmem:[%s1379_s5 + $0x1c0] sm:$0xff]  ;;  %v202_v57 = vld [vmem:[%s1379_s5 + $0x1c8] sm:$0xff]  ;;  %v203_v59 = vld [vmem:[%s1379_s5 + $0x1d0] sm:$0xff] }
  0x2a   : > { %1097 = vmatmul.mubr.msk.f32.gmra.mrb[8].mxu0 %vm213_vm0, %v154_v24  ;;  %v172_v60 = vld [vmem:[%s1379_s5 + $0xd8] sm:$0xff]  ;;  %v173_v62 = vld [vmem:[%s1379_s5 + $0xe0] sm:$0xff]  ;;  %v174_v0 = vld [vmem:[%s1379_s5 + $0xe8] sm:$0xff] }
  0x2b   : > { %1145 = vmatmul.mubr.msk.f32.gmra.mrb[8].mxu1 %vm213_vm0, %v186_v25  ;;  %1099 = vmatprep.mubr.msk.f32.mxu0 %vm213_vm0, %v155_v26  ;;  %v204_v61 = vld [vmem:[%s1379_s5 + $0x1d8] sm:$0xff]  ;;  %v205_v63 = vld [vmem:[%s1379_s5 + $0x1e0] sm:$0xff]  ;;  %v206_v1 = vld [vmem:[%s1379_s5 + $0x1e8] sm:$0xff] }
  0x2c   : > { %1147 = vmatprep.mubr.msk.f32.mxu1 %vm213_vm0, %v187_v27  ;;  %v175_v2 = vld [vmem:[%s1379_s5 + $0xf0] sm:$0xff]  ;;  %v176_v4 = vld [vmem:[%s1379_s5 + $0xf8] sm:$0xff] }
  0x2d   : > { %v207_v3 = vld [vmem:[%s1379_s5 + $0x1f0] sm:$0xff]  ;;  %v208_v5 = vld [vmem:[%s1379_s5 + $0x1f8] sm:$0xff] }
  0x2e   : > { %1100 = vmatmul.mubr.msk.f32.gmra.mrb[10].mxu0 %vm213_vm0, %v156_v28 }
  0x2f   : > { %1148 = vmatmul.mubr.msk.f32.gmra.mrb[10].mxu1 %vm213_vm0, %v188_v29  ;;  %1102 = vmatprep.mubr.msk.f32.mxu0 %vm213_vm0, %v157_v30 }
  0x30   : > { %1150 = vmatprep.mubr.msk.f32.mxu1 %vm213_vm0, %v189_v31 }
  0x32   : > { %1103 = vmatmul.mubr.msk.f32.gmra.mrb[12].mxu0 %vm213_vm0, %v158_v32 }
  0x33   : > { %1151 = vmatmul.mubr.msk.f32.gmra.mrb[12].mxu1 %vm213_vm0, %v190_v33  ;;  %1105 = vmatprep.mubr.msk.f32.mxu0 %vm213_vm0, %v159_v34 }
  0x34   : > { %1153 = vmatprep.mubr.msk.f32.mxu1 %vm213_vm0, %v191_v35 }
  0x36   : > { %1106 = vmatmul.mubr.msk.f32.gmra.mrb[14].mxu0 %vm213_vm0, %v160_v36 }
  0x37   : > { %1154 = vmatmul.mubr.msk.f32.gmra.mrb[14].mxu1 %vm213_vm0, %v192_v37  ;;  %1108 = vmatprep.mubr.msk.f32.mxu0 %vm213_vm0, %v161_v38 }
  0x38   : > { %1156 = vmatprep.mubr.msk.f32.mxu1 %vm213_vm0, %v193_v39 }
  0x3a   : > { %1109 = vmatmul.mubr.msk.f32.gmra.mrb[16].mxu0 %vm213_vm0, %v162_v40 }
  0x3b   : > { %1157 = vmatmul.mubr.msk.f32.gmra.mrb[16].mxu1 %vm213_vm0, %v194_v41  ;;  %1111 = vmatprep.mubr.msk.f32.mxu0 %vm213_vm0, %v163_v42 }
  0x3c   : > { %1159 = vmatprep.mubr.msk.f32.mxu1 %vm213_vm0, %v195_v43 }
  0x3e   : > { %1112 = vmatmul.mubr.msk.f32.gmra.mrb[18].mxu0 %vm213_vm0, %v164_v44 }
  0x3f   : > { %1160 = vmatmul.mubr.msk.f32.gmra.mrb[18].mxu1 %vm213_vm0, %v196_v45  ;;  %1114 = vmatprep.mubr.msk.f32.mxu0 %vm213_vm0, %v165_v46 }
  0x40   : > { %1162 = vmatprep.mubr.msk.f32.mxu1 %vm213_vm0, %v197_v47 }
  0x42   : > { %1115 = vmatmul.mubr.msk.f32.gmra.mrb[20].mxu0 %vm213_vm0, %v166_v48 }
  0x43   : > { %1163 = vmatmul.mubr.msk.f32.gmra.mrb[20].mxu1 %vm213_vm0, %v198_v49  ;;  %1117 = vmatprep.mubr.msk.f32.mxu0 %vm213_vm0, %v167_v50 }
  0x44   : > { %1165 = vmatprep.mubr.msk.f32.mxu1 %vm213_vm0, %v199_v51 }
  0x46   : > { %1118 = vmatmul.mubr.msk.f32.gmra.mrb[22].mxu0 %vm213_vm0, %v168_v52 }
  0x47   : > { %1166 = vmatmul.mubr.msk.f32.gmra.mrb[22].mxu1 %vm213_vm0, %v200_v53  ;;  %1120 = vmatprep.mubr.msk.f32.mxu0 %vm213_vm0, %v169_v54 }
  0x48   : > { %1168 = vmatprep.mubr.msk.f32.mxu1 %vm213_vm0, %v201_v55 }
  0x4a   : > { %1121 = vmatmul.mubr.msk.f32.gmra.mrb[24].mxu0 %vm213_vm0, %v170_v56 }
  0x4b   : > { %1169 = vmatmul.mubr.msk.f32.gmra.mrb[24].mxu1 %vm213_vm0, %v202_v57  ;;  %1123 = vmatprep.mubr.msk.f32.mxu0 %vm213_vm0, %v171_v58 }
  0x4c   : > { %1171 = vmatprep.mubr.msk.f32.mxu1 %vm213_vm0, %v203_v59 }
  0x4e   : > { %1124 = vmatmul.mubr.msk.f32.gmra.mrb[26].mxu0 %vm213_vm0, %v172_v60 }
  0x4f   : > { %1172 = vmatmul.mubr.msk.f32.gmra.mrb[26].mxu1 %vm213_vm0, %v204_v61  ;;  %1126 = vmatprep.mubr.msk.f32.mxu0 %vm213_vm0, %v173_v62 }
  0x50   : > { %1174 = vmatprep.mubr.msk.f32.mxu1 %vm213_vm0, %v205_v63 }
  0x52   : > { %1127 = vmatmul.mubr.msk.f32.gmra.mrb[28].mxu0 %vm213_vm0, %v174_v0 }
  0x53   : > { %1175 = vmatmul.mubr.msk.f32.gmra.mrb[28].mxu1 %vm213_vm0, %v206_v1  ;;  %1129 = vmatprep.mubr.msk.f32.mxu0 %vm213_vm0, %v175_v2 }
  0x54   : > { %1177 = vmatprep.mubr.msk.f32.mxu1 %vm213_vm0, %v207_v3 }
  0x56   : > { %1130 = vmatmul.mubr.msk.f32.gmra.mrb[30].mxu0 %vm213_vm0, %v176_v4 }
  0x57   : > { %1178 = vmatmul.mubr.msk.f32.gmra.mrb[30].mxu1 %vm213_vm0, %v208_v5 }
  0xed   : > { %v1086_v6 = vpop.f32.mrb[0].mxu0 }
  0xee   : > { %v1134_v7 = vpop.f32.mrb[0].mxu1  ;;  %792 = vst [vmem:[%s1512_s8 + $0x8] sm:$0xff] %v1086_v6  ;;  %v472_v8 = vpop.f32.mrb[1].mxu0 }
  0xef   : > { %824 = vst [vmem:[%s1512_s8 + $0x108] sm:$0xff] %v1134_v7  ;;  %v632_v9 = vpop.f32.mrb[1].mxu1  ;;  %791 = vst [vmem:[%s1512_s8] sm:$0xff] %v472_v8 }
  0xf0   : > { %823 = vst [vmem:[%s1512_s8 + $0x100] sm:$0xff] %v632_v9 }
  0xf1   : > { %v1089_v10 = vpop.f32.mrb[2].mxu0 }
  0xf2   : > { %v1137_v11 = vpop.f32.mrb[2].mxu1  ;;  %794 = vst [vmem:[%s1512_s8 + $0x18] sm:$0xff] %v1089_v10  ;;  %v482_v12 = vpop.f32.mrb[3].mxu0 }
  0xf3   : > { %826 = vst [vmem:[%s1512_s8 + $0x118] sm:$0xff] %v1137_v11  ;;  %v642_v13 = vpop.f32.mrb[3].mxu1  ;;  %793 = vst [vmem:[%s1512_s8 + $0x10] sm:$0xff] %v482_v12 }
  0xf4   : > { %825 = vst [vmem:[%s1512_s8 + $0x110] sm:$0xff] %v642_v13 }
  0xf5   : > { %v1092_v14 = vpop.f32.mrb[4].mxu0 }
  0xf6   : > { %v1140_v15 = vpop.f32.mrb[4].mxu1  ;;  %796 = vst [vmem:[%s1512_s8 + $0x28] sm:$0xff] %v1092_v14  ;;  %v492_v16 = vpop.f32.mrb[5].mxu0 }
  0xf7   : > { %828 = vst [vmem:[%s1512_s8 + $0x128] sm:$0xff] %v1140_v15  ;;  %v652_v17 = vpop.f32.mrb[5].mxu1  ;;  %795 = vst [vmem:[%s1512_s8 + $0x20] sm:$0xff] %v492_v16 }
  0xf8   : > { %827 = vst [vmem:[%s1512_s8 + $0x120] sm:$0xff] %v652_v17 }
  0xf9   : > { %v1095_v18 = vpop.f32.mrb[6].mxu0 }
  0xfa   : > { %v1143_v19 = vpop.f32.mrb[6].mxu1  ;;  %798 = vst [vmem:[%s1512_s8 + $0x38] sm:$0xff] %v1095_v18  ;;  %v502_v20 = vpop.f32.mrb[7].mxu0 }
  0xfb   : > { %830 = vst [vmem:[%s1512_s8 + $0x138] sm:$0xff] %v1143_v19  ;;  %v662_v21 = vpop.f32.mrb[7].mxu1  ;;  %797 = vst [vmem:[%s1512_s8 + $0x30] sm:$0xff] %v502_v20 }
  0xfc   : > { %829 = vst [vmem:[%s1512_s8 + $0x130] sm:$0xff] %v662_v21 }
  0xfd   : > { %v1098_v22 = vpop.f32.mrb[8].mxu0 }
  0xfe   : > { %v1146_v23 = vpop.f32.mrb[8].mxu1  ;;  %800 = vst [vmem:[%s1512_s8 + $0x48] sm:$0xff] %v1098_v22  ;;  %v512_v24 = vpop.f32.mrb[9].mxu0 }
  0xff   : > { %832 = vst [vmem:[%s1512_s8 + $0x148] sm:$0xff] %v1146_v23  ;;  %v672_v25 = vpop.f32.mrb[9].mxu1  ;;  %799 = vst [vmem:[%s1512_s8 + $0x40] sm:$0xff] %v512_v24 }
 0x100   : > { %831 = vst [vmem:[%s1512_s8 + $0x140] sm:$0xff] %v672_v25 }
 0x101   : > { %v1101_v26 = vpop.f32.mrb[10].mxu0 }
 0x102   : > { %v1149_v27 = vpop.f32.mrb[10].mxu1  ;;  %802 = vst [vmem:[%s1512_s8 + $0x58] sm:$0xff] %v1101_v26  ;;  %v522_v28 = vpop.f32.mrb[11].mxu0 }
 0x103   : > { %834 = vst [vmem:[%s1512_s8 + $0x158] sm:$0xff] %v1149_v27  ;;  %v682_v29 = vpop.f32.mrb[11].mxu1  ;;  %801 = vst [vmem:[%s1512_s8 + $0x50] sm:$0xff] %v522_v28 }
 0x104   : > { %833 = vst [vmem:[%s1512_s8 + $0x150] sm:$0xff] %v682_v29 }
 0x105   : > { %v1104_v30 = vpop.f32.mrb[12].mxu0 }
 0x106   : > { %v1152_v31 = vpop.f32.mrb[12].mxu1  ;;  %804 = vst [vmem:[%s1512_s8 + $0x68] sm:$0xff] %v1104_v30  ;;  %v532_v32 = vpop.f32.mrb[13].mxu0 }
 0x107   : > { %836 = vst [vmem:[%s1512_s8 + $0x168] sm:$0xff] %v1152_v31  ;;  %v692_v33 = vpop.f32.mrb[13].mxu1  ;;  %803 = vst [vmem:[%s1512_s8 + $0x60] sm:$0xff] %v532_v32 }
 0x108   : > { %835 = vst [vmem:[%s1512_s8 + $0x160] sm:$0xff] %v692_v33 }
 0x109   : > { %v1107_v34 = vpop.f32.mrb[14].mxu0 }
 0x10a   : > { %v1155_v35 = vpop.f32.mrb[14].mxu1  ;;  %806 = vst [vmem:[%s1512_s8 + $0x78] sm:$0xff] %v1107_v34  ;;  %v542_v36 = vpop.f32.mrb[15].mxu0 }
 0x10b   : > { %838 = vst [vmem:[%s1512_s8 + $0x178] sm:$0xff] %v1155_v35  ;;  %v702_v37 = vpop.f32.mrb[15].mxu1  ;;  %805 = vst [vmem:[%s1512_s8 + $0x70] sm:$0xff] %v542_v36 }
 0x10c   : > { %837 = vst [vmem:[%s1512_s8 + $0x170] sm:$0xff] %v702_v37 }
 0x10d   : > { %v1110_v38 = vpop.f32.mrb[16].mxu0 }
 0x10e   : > { %v1158_v39 = vpop.f32.mrb[16].mxu1  ;;  %808 = vst [vmem:[%s1512_s8 + $0x88] sm:$0xff] %v1110_v38  ;;  %v552_v40 = vpop.f32.mrb[17].mxu0 }
 0x10f   : > { %840 = vst [vmem:[%s1512_s8 + $0x188] sm:$0xff] %v1158_v39  ;;  %v712_v41 = vpop.f32.mrb[17].mxu1  ;;  %807 = vst [vmem:[%s1512_s8 + $0x80] sm:$0xff] %v552_v40 }
 0x110   : > { %839 = vst [vmem:[%s1512_s8 + $0x180] sm:$0xff] %v712_v41 }
 0x111   : > { %v1113_v42 = vpop.f32.mrb[18].mxu0 }
 0x112   : > { %v1161_v43 = vpop.f32.mrb[18].mxu1  ;;  %810 = vst [vmem:[%s1512_s8 + $0x98] sm:$0xff] %v1113_v42  ;;  %v562_v44 = vpop.f32.mrb[19].mxu0 }
 0x113   : > { %842 = vst [vmem:[%s1512_s8 + $0x198] sm:$0xff] %v1161_v43  ;;  %v722_v45 = vpop.f32.mrb[19].mxu1  ;;  %809 = vst [vmem:[%s1512_s8 + $0x90] sm:$0xff] %v562_v44 }
 0x114   : > { %841 = vst [vmem:[%s1512_s8 + $0x190] sm:$0xff] %v722_v45 }
 0x115   : > { %v1116_v46 = vpop.f32.mrb[20].mxu0 }
 0x116   : > { %v1164_v47 = vpop.f32.mrb[20].mxu1  ;;  %812 = vst [vmem:[%s1512_s8 + $0xa8] sm:$0xff] %v1116_v46  ;;  %v572_v48 = vpop.f32.mrb[21].mxu0 }
 0x117   : > { %844 = vst [vmem:[%s1512_s8 + $0x1a8] sm:$0xff] %v1164_v47  ;;  %v732_v49 = vpop.f32.mrb[21].mxu1  ;;  %811 = vst [vmem:[%s1512_s8 + $0xa0] sm:$0xff] %v572_v48 }
 0x118   : > { %843 = vst [vmem:[%s1512_s8 + $0x1a0] sm:$0xff] %v732_v49 }
 0x119   : > { %v1119_v50 = vpop.f32.mrb[22].mxu0 }
 0x11a   : > { %v1167_v51 = vpop.f32.mrb[22].mxu1  ;;  %814 = vst [vmem:[%s1512_s8 + $0xb8] sm:$0xff] %v1119_v50  ;;  %v582_v52 = vpop.f32.mrb[23].mxu0 }
 0x11b   : > { %846 = vst [vmem:[%s1512_s8 + $0x1b8] sm:$0xff] %v1167_v51  ;;  %v742_v53 = vpop.f32.mrb[23].mxu1  ;;  %813 = vst [vmem:[%s1512_s8 + $0xb0] sm:$0xff] %v582_v52 }
 0x11c   : > { %845 = vst [vmem:[%s1512_s8 + $0x1b0] sm:$0xff] %v742_v53 }
 0x11d   : > { %v1122_v54 = vpop.f32.mrb[24].mxu0 }
 0x11e   : > { %v1170_v55 = vpop.f32.mrb[24].mxu1  ;;  %816 = vst [vmem:[%s1512_s8 + $0xc8] sm:$0xff] %v1122_v54  ;;  %v592_v56 = vpop.f32.mrb[25].mxu0 }
 0x11f   : > { %848 = vst [vmem:[%s1512_s8 + $0x1c8] sm:$0xff] %v1170_v55  ;;  %v752_v57 = vpop.f32.mrb[25].mxu1  ;;  %815 = vst [vmem:[%s1512_s8 + $0xc0] sm:$0xff] %v592_v56 }
 0x120   : > { %847 = vst [vmem:[%s1512_s8 + $0x1c0] sm:$0xff] %v752_v57 }
 0x121   : > { %v1125_v58 = vpop.f32.mrb[26].mxu0 }
 0x122   : > { %v1173_v59 = vpop.f32.mrb[26].mxu1  ;;  %818 = vst [vmem:[%s1512_s8 + $0xd8] sm:$0xff] %v1125_v58  ;;  %v602_v60 = vpop.f32.mrb[27].mxu0 }
 0x123   : > { %850 = vst [vmem:[%s1512_s8 + $0x1d8] sm:$0xff] %v1173_v59  ;;  %v762_v61 = vpop.f32.mrb[27].mxu1  ;;  %817 = vst [vmem:[%s1512_s8 + $0xd0] sm:$0xff] %v602_v60 }
 0x124   : > { %849 = vst [vmem:[%s1512_s8 + $0x1d0] sm:$0xff] %v762_v61 }
 0x125   : > { %v1128_v62 = vpop.f32.mrb[28].mxu0 }
 0x126   : > { %v1176_v63 = vpop.f32.mrb[28].mxu1  ;;  %820 = vst [vmem:[%s1512_s8 + $0xe8] sm:$0xff] %v1128_v62  ;;  %v612_v0 = vpop.f32.mrb[29].mxu0 }
 0x127   : > { %852 = vst [vmem:[%s1512_s8 + $0x1e8] sm:$0xff] %v1176_v63  ;;  %v772_v1 = vpop.f32.mrb[29].mxu1  ;;  %819 = vst [vmem:[%s1512_s8 + $0xe0] sm:$0xff] %v612_v0 }
 0x128   : > { %851 = vst [vmem:[%s1512_s8 + $0x1e0] sm:$0xff] %v772_v1 }
 0x129   : > { %v1131_v2 = vpop.f32.mrb[30].mxu0 }
 0x12a   : > { %v1179_v3 = vpop.f32.mrb[30].mxu1  ;;  %822 = vst [vmem:[%s1512_s8 + $0xf8] sm:$0xff] %v1131_v2  ;;  %v622_v4 = vpop.f32.mrb[31].mxu0 }
 0x12b   : > { %854 = vst [vmem:[%s1512_s8 + $0x1f8] sm:$0xff] %v1179_v3  ;;  %v782_v5 = vpop.f32.mrb[31].mxu1  ;;  %821 = vst [vmem:[%s1512_s8 + $0xf0] sm:$0xff] %v622_v4 }
 0x12c   : > { %853 = vst [vmem:[%s1512_s8 + $0x1f0] sm:$0xff] %v782_v5 }
 0x12d   : > { %1246 = shalt.err (!%p1243_p3)
}
 0x12e   : > { %s1247_s27 = scalar_lea.hbm %s1579_s22, 8192  ;;  %s1251_s30 = scalar_lea.hbm %s1632_s2, 24576 }
 0x12f   : > { %p1248_p4 = scmp.ne.s32.totalorder %s1579_s22, %s1247_s27  ;;  %p1252_p9 = scmp.lt.u32.totalorder %s1579_s22, %s1632_s2 }
 0x130   : > { %p1253_p10 = scmp.lt.u32.totalorder %s1251_s30, %s1247_s27  ;;  %p1255_p12 = scmp.lt.u32.totalorder %s1247_s27, %s1579_s22 }
 0x131   : > { %p1249_p7 = pnand %p1248_p4, %p1353_p5 }
 0x132   : > { %p1254_p11 = por %p1253_p10, %p1252_p9 }
 0x133   : > { %p1250_p8 = pneg %p1249_p7 }
 0x134   : > { %p1256_p13 = por %p1255_p12, %p1254_p11 }
 0x136   : > { %p1257_p0 = pnand %p1256_p13, %p1250_p8 }
 0x138   : > { %1260 = shalt.err (!%p1257_p0)
}
 0x139   : > { %s1298_s5 = smov 128   ;;  %s1299_s6 = smov 8  }
 0x13a   : > { %1192 = dma.vmem_to_hbm [thread:$0]  (%p1353_p5), %s1581_s16, 8192, %s1579_s22, %s1589_s13, %s1298_s5, %s1298_s5, %s1299_s6  }
 0x13b PF: > { %p1198_p1 = scmp.ge.s32.totalorder %s1295_s12, 2  ;;  %s884_s7 = sand.u32 1, %s1283_s9  }
 0x13c   : > { %s885_s8 = scalar_lea.sflag [#allocation3], %s884_s7 }
 0x13d   : > { %p1195_p2 = pnand %p1198_p1, %p1357_p6 }
 0x13f   : > { %1278 = dma.done.wait (!%p1195_p2), %s885_s8, 8192  }
 0x140   : > { %1280 = vsyncadd (!%p1195_p2), %s885_s8, 4294959104  ;;  %p12_p3 = scmp.ge.s32.totalorder %s1340_s15, 5   ;;  %s1635_s9 = smov %s1287_s10 }
 0x141   : > { %s1636_s10 = smov %s1291_s11  ;;  %s1637_s11 = smov %s1351_s18 }
 0x142   : > { %s1638_s12 = smov %s1340_s15  ;;  %14 = sbr.rel (!%p12_p3) target bundleno = 3 (0x3), region = 63 }
 0x149   :  { %890 = vsyncpa [#allocation3], 1 }
 0x14a   :  { %892 = vsyncpa [#allocation3 + $0x1], 1 }

</bundles_post_ra>
